<compile_context>
chip_gen: v6e
topology: v6e:2x2x1
jax: 0.10.0
libtpu: 0.0.40
codegen_flags: <defaults>
</compile_context>

<pallas_src>
import functools

import jax
import jax.numpy as jnp
from jax.experimental import pallas as pl
from jax.experimental.pallas import tpu as pltpu


# ----------------------------------------------------------------------------
# Tiled grouped linear:  out[g] = x @ wt[g] + b[g]
#   x: [M, K] f32, wt: [G, K, N] (bf16, pre-transposed), b: [G, 1, N] f32
#   -> [G, M, N] f32
# ----------------------------------------------------------------------------
def _pick_tile(dim, pref, align):
    """Largest tile <= pref that is a multiple of `align` and divides dim
    (or the full dim, which is always legal)."""
    if dim <= pref:
        return dim
    t = (pref // align) * align
    while t >= align:
        if dim % t == 0:
            return t
        t -= align
    return dim


def _grouped_linear_kernel(x_ref, wt_ref, b_ref, o_ref, acc_ref):
    k = pl.program_id(3)

    @pl.when(k == 0)
    def _():
        acc_ref[...] = jnp.zeros_like(acc_ref)

    acc_ref[...] += jnp.dot(
        x_ref[...].astype(jnp.bfloat16),
        wt_ref[0],                                  # already bf16
        preferred_element_type=jnp.float32,
    )

    @pl.when(k == pl.num_programs(3) - 1)
    def _():
        o_ref[0] = (acc_ref[...] + b_ref[0]).astype(o_ref.dtype)


def pallas_grouped_linear(x, wt_g, b_g):
    M, K = x.shape
    G, _, N = wt_g.shape
    tm = _pick_tile(M, 256, 8)
    tn = _pick_tile(N, 512, 128)
    tk = _pick_tile(K, 512, 128)
    grid = (G, M // tm, N // tn, K // tk)
    return pl.pallas_call(
        _grouped_linear_kernel,
        grid=grid,
        in_specs=[
            pl.BlockSpec((tm, tk), lambda g, i, j, k: (i, k)),
            pl.BlockSpec((1, tk, tn), lambda g, i, j, k: (g, k, j)),
            pl.BlockSpec((1, 1, tn), lambda g, i, j, k: (g, 0, j)),
        ],
        out_specs=pl.BlockSpec((1, tm, tn), lambda g, i, j, k: (g, i, j)),
        out_shape=jax.ShapeDtypeStruct((G, M, N), jnp.float32),
        scratch_shapes=[pltpu.VMEM((tm, tn), jnp.float32)],
        compiler_params=pltpu.CompilerParams(
            dimension_semantics=("parallel", "parallel", "parallel", "arbitrary")
        ),
    )(x, wt_g, b_g)


# ----------------------------------------------------------------------------
# Attention core: one batch element per grid step, all heads in the step.
# ----------------------------------------------------------------------------
def _attn_kernel(*refs, H, D, has_mask, emit_full):
    q_ref, k_ref, v_ref = refs[0], refs[1], refs[2]
    i = 3
    lm_ref = None
    if has_mask:
        lm_ref = refs[i]
        i += 1
    attn_ref, p0m_ref, pmm_ref = refs[i], refs[i + 1], refs[i + 2]
    p0f_ref = refs[i + 3] if emit_full else None

    q = q_ref[0, 0].astype(jnp.bfloat16)          # [T, E]  (q already pre-scaled)
    k = k_ref[0, 0].astype(jnp.bfloat16)          # [S, E]
    v = v_ref[0, 0].astype(jnp.bfloat16)          # [S, E]
    T = q.shape[0]
    S = k.shape[0]

    p0_acc = jnp.zeros((T, S), jnp.float32)
    pm_acc = jnp.zeros((T, S), jnp.float32)

    for h in range(H):                            # static unroll over heads
        lo = h * D
        qh = q[:, lo:lo + D]                      # [T, D]
        kh = k[:, lo:lo + D]                      # [S, D]
        vh = v[:, lo:lo + D]                      # [S, D]

        s = jax.lax.dot_general(                  # [T, S], f32 accumulation
            qh, kh, (((1,), (1,)), ((), ())),
            preferred_element_type=jnp.float32)
        m = jnp.max(s, axis=-1, keepdims=True)
        e = jnp.exp(s - m)
        p0 = e * pl.reciprocal(jnp.sum(e, axis=-1, keepdims=True), approx=True)

        p0_acc = p0_acc + p0
        if emit_full:
            p0f_ref[0, h] = p0                    # per-head pre-mask weights

        pm = p0 * lm_ref[0, h] if has_mask else p0
        pm_acc = pm_acc + pm

        o_h = jnp.dot(pm.astype(jnp.bfloat16), vh,
                      preferred_element_type=jnp.float32)   # [T, D]
        attn_ref[0, :, lo:lo + D] = o_h.astype(attn_ref.dtype)

    inv_h = jnp.float32(1.0 / H)
    p0m_ref[0] = p0_acc * inv_h                   # head-mean pre-mask softmax
    pmm_ref[0] = pm_acc * inv_h                   # head-mean post-mask weights


def pallas_attention_core(q_arr, k_arr, v_arr, q_idx, k_idx, v_idx,
                          lm4, H, D, emit_full):
    """q_arr: [Gq, B, T, E], k_arr/v_arr: [Gk, B, S, E] (may be the same array
    with different leading indices).  lm4: optional [B, H, T, S]."""
    _, B, T, E = q_arr.shape
    S = k_arr.shape[2]
    has_mask = lm4 is not None

    kernel = functools.partial(_attn_kernel, H=H, D=D,
                               has_mask=has_mask, emit_full=emit_full)

    in_specs = [
        pl.BlockSpec((1, 1, T, E), lambda b, g=q_idx: (g, b, 0, 0)),
        pl.BlockSpec((1, 1, S, E), lambda b, g=k_idx: (g, b, 0, 0)),
        pl.BlockSpec((1, 1, S, E), lambda b, g=v_idx: (g, b, 0, 0)),
    ]
    args = [q_arr, k_arr, v_arr]
    if has_mask:
        in_specs.append(pl.BlockSpec((1, H, T, S), lambda b: (b, 0, 0, 0)))
        args.append(lm4)

    out_specs = [
        pl.BlockSpec((1, T, E), lambda b: (b, 0, 0)),
        pl.BlockSpec((1, T, S), lambda b: (b, 0, 0)),
        pl.BlockSpec((1, T, S), lambda b: (b, 0, 0)),
    ]
    out_shape = [
        jax.ShapeDtypeStruct((B, T, E), jnp.float32),
        jax.ShapeDtypeStruct((B, T, S), jnp.float32),
        jax.ShapeDtypeStruct((B, T, S), jnp.float32),
    ]
    if emit_full:
        out_specs.append(pl.BlockSpec((1, H, T, S), lambda b: (b, 0, 0, 0)))
        out_shape.append(jax.ShapeDtypeStruct((B, H, T, S), jnp.float32))

    return pl.pallas_call(
        kernel,
        grid=(B,),
        in_specs=in_specs,
        out_specs=out_specs,
        out_shape=out_shape,
        compiler_params=pltpu.CompilerParams(dimension_semantics=("parallel",)),
    )(*args)


# ----------------------------------------------------------------------------
# Module (parameters + glue)
# ----------------------------------------------------------------------------
def _xavier_uniform(key, shape):
    fan_out, fan_in = shape
    bound = (6.0 / (fan_in + fan_out)) ** 0.5
    return jax.random.uniform(key, shape, jnp.float32, -bound, bound)


class ResidualLocalMultiheadAttentionPallas:
    """JAX/Pallas port of the PyTorch ResidualLocalMultiheadAttention forward.

    Supports the standard (non-incremental) path with bias=True,
    add_bias_kv=False, add_zero_attn=False, dropout inactive (eval mode),
    and local_mask_transform in {'none', 'avg'}.
    """

    def __init__(self, embed_dim, num_heads, key, local_mask_transform="avg"):
        assert embed_dim % num_heads == 0
        assert local_mask_transform in ("none", "avg")
        # TODO(synk): 'linear' local_mask_transform (extra nn.Linear over heads) not implemented.
        self.embed_dim = embed_dim
        self.num_heads = num_heads
        self.head_dim = embed_dim // num_heads
        self.scaling = self.head_dim ** (-0.5)
        self.local_mask_transform = local_mask_transform
        E = embed_dim

        k1, k2 = jax.random.split(key)
        # Torch-layout parameters (kept in f32 for the reference).
        self.in_proj_weight = _xavier_uniform(k1, (3 * E, E))
        self.in_proj_bias = jnp.zeros((3 * E,), jnp.float32)
        self.out_proj_weight = _xavier_uniform(k2, (E, E))
        self.out_proj_bias = jnp.zeros((E,), jnp.float32)

        # Kernel-ready parameters: pre-transposed, grouped, q-slab pre-scaled,
        # weights stored in bf16 (MXU operands), biases kept f32.
        scale_vec = jnp.array([self.scaling, 1.0, 1.0], jnp.float32).reshape(3, 1, 1)
        wt_in = jnp.transpose(self.in_proj_weight).reshape(E, 3, E).transpose(1, 0, 2)
        self._wt_in = (wt_in * scale_vec).astype(jnp.bfloat16)            # [3, E, E]
        self._b_in = self.in_proj_bias.reshape(3, 1, E) * scale_vec       # [3, 1, E]
        self._wt_out = jnp.transpose(self.out_proj_weight)[None].astype(jnp.bfloat16)  # [1,E,E]
        self._b_out = self.out_proj_bias.reshape(1, 1, E)                 # [1, 1, E]

    def forward(self, query, key, value, local_attn_mask=None, need_weights=True):
        # TODO(synk): key_padding_mask / attn_mask / incremental_state / dropout paths not implemented.
        T, B, E = query.shape
        S = key.shape[0]
        H, D = self.num_heads, self.head_dim
        assert E == self.embed_dim

        # Rows ordered (b, t) so the projection output reshapes to [*, B, T, E].
        xq = jnp.transpose(query, (1, 0, 2)).reshape(B * T, E)

        same_qkv = (query is key) and (key is value)
        if same_qkv:
            qkv = pallas_grouped_linear(xq, self._wt_in, self._b_in)      # [3, B*T, E]
            qkv = qkv.reshape(3, B, T, E)
            q_arr = k_arr = v_arr = qkv
            qi, ki, vi = 0, 1, 2
        else:
            q_arr = pallas_grouped_linear(xq, self._wt_in[0:1],
                                          self._b_in[0:1]).reshape(1, B, T, E)
            qi = 0
            xk = jnp.transpose(key, (1, 0, 2)).reshape(B * S, E)
            if key is value:
                kv = pallas_grouped_linear(xk, self._wt_in[1:3],
                                           self._b_in[1:3]).reshape(2, B, S, E)
                k_arr = v_arr = kv
                ki, vi = 0, 1
            else:
                xv = jnp.transpose(value, (1, 0, 2)).reshape(B * S, E)
                k_arr = pallas_grouped_linear(xk, self._wt_in[1:2],
                                              self._b_in[1:2]).reshape(1, B, S, E)
                v_arr = pallas_grouped_linear(xv, self._wt_in[2:3],
                                              self._b_in[2:3]).reshape(1, B, S, E)
                ki = vi = 0

        lm4 = None
        if local_attn_mask is not None:
            lm4 = local_attn_mask.reshape(B, H, T, S).astype(jnp.float32)

        emit_full = (self.local_mask_transform == "none")
        outs = pallas_attention_core(q_arr, k_arr, v_arr, qi, ki, vi,
                                     lm4, H, D, emit_full)
        if emit_full:
            attn_b, p0_mean, pm_mean, p0_full = outs
        else:
            attn_b, p0_mean, pm_mean = outs
            p0_full = None

        # Output projection on [B*T, E] rows, then back to [T, B, E].
        out = pallas_grouped_linear(attn_b.reshape(B * T, E),
                                    self._wt_out, self._b_out)            # [1, B*T, E]
        attn = jnp.transpose(out.reshape(B, T, E), (1, 0, 2))

        if self.local_mask_transform == "avg":
            upstream = jnp.broadcast_to(p0_mean[:, None],
                                        (B, H, T, S)).reshape(B * H, T, S)
        else:  # 'none'
            upstream = p0_full.reshape(B * H, T, S)

        attn_weights = pm_mean if need_weights else None                  # [B, T, S]
        return attn, attn_weights, upstream


# ----------------------------------------------------------------------------
# Pure-JAX reference (mirrors the PyTorch forward) for a correctness check
# ----------------------------------------------------------------------------
def reference_forward(mod, query, key, value, local_attn_mask=None):
    T, B, E = query.shape
    S = key.shape[0]
    H, D = mod.num_heads, mod.head_dim
    w, b = mod.in_proj_weight, mod.in_proj_bias
    q = query @ w[:E].T + b[:E]
    k = key @ w[E:2 * E].T + b[E:2 * E]
    v = value @ w[2 * E:].T + b[2 * E:]
    q = q * mod.scaling
    qh = q.reshape(T, B * H, D).transpose(1, 0, 2)
    kh = k.reshape(S, B * H, D).transpose(1, 0, 2)
    vh = v.reshape(S, B * H, D).transpose(1, 0, 2)
    s = jnp.einsum("btd,bsd->bts", qh, kh)
    p0 = jax.nn.softmax(s, axis=-1)
    if mod.local_mask_transform == "avg":
        up = jnp.broadcast_to(p0.reshape(B, H, T, S).mean(1, keepdims=True),
                              (B, H, T, S)).reshape(B * H, T, S)
    else:
        up = p0
    p = p0 * local_attn_mask if local_attn_mask is not None else p0
    attn = jnp.einsum("bts,bsd->btd", p, vh)
    attn = attn.transpose(1, 0, 2).reshape(T, B, E)
    attn = attn @ mod.out_proj_weight.T + mod.out_proj_bias
    attn_weights = p.reshape(B, H, T, S).sum(1) / H
    return attn, attn_weights, up


if __name__ == "__main__":
    T, B, E, H = 8, 2, 32, 4  # tgt_len, batch, embed_dim, num_heads (head_dim = 8)

    root = jax.random.PRNGKey(0)
    k_params, k_q, k_m = jax.random.split(root, 3)
    query = jax.random.normal(k_q, (T, B, E), jnp.float32)
    lm = jax.random.uniform(k_m, (B * H, T, T), jnp.float32, 0.1, 1.0)

    for transform in ("avg", "none"):
        mod = ResidualLocalMultiheadAttentionPallas(
            E, H, k_params, local_mask_transform=transform)
        for mask in (None, lm):
            attn, attn_weights, upstream = mod.forward(
                query, query, query, local_attn_mask=mask)
            jax.block_until_ready((attn, attn_weights, upstream))

            ref_attn, ref_w, ref_up = reference_forward(
                mod, query, query, query, local_attn_mask=mask)

            # bf16 MXU operands + approx reciprocal -> slightly looser tolerances.
            assert jnp.allclose(attn, ref_attn, atol=3e-2, rtol=3e-2)
            assert jnp.allclose(attn_weights, ref_w, atol=1e-2, rtol=1e-2)
            assert jnp.allclose(upstream, ref_up, atol=1e-2, rtol=1e-2)
            assert attn.shape == (T, B, E)
            assert attn_weights.shape == (B, T, T)
            assert upstream.shape == (B * H, T, T)

    print("KERNEL_OK")
</pallas_src>

<mosaic_0001>
module attributes {stable_mosaic.version = 11 : i64} {
  func.func @_grouped_linear_kernel(%arg0: i32, %arg1: i32, %arg2: i32, %arg3: i32, %arg4: memref<16x32xf32, #tpu.memory_space<vmem>>, %arg5: memref<1x32x32xbf16, #tpu.memory_space<vmem>>, %arg6: memref<1x1x32xf32, #tpu.memory_space<vmem>>, %arg7: memref<1x16x32xf32, #tpu.memory_space<vmem>>, %arg8: memref<16x32xf32, #tpu.memory_space<vmem>>) attributes {dimension_semantics = [#tpu.dimension_semantics<parallel>, #tpu.dimension_semantics<parallel>, #tpu.dimension_semantics<parallel>, #tpu.dimension_semantics<arbitrary>], iteration_bounds = array<i64: 3, 1, 1, 1>, scalar_prefetch = 0 : i64, scratch_operands = 1 : i64, tpu.core_type = #tpu.core_type<tc>, window_params = [{transform_indices = @transform_0, window_bounds = array<i64: 16, 32>}, {transform_indices = @transform_1, window_bounds = array<i64: 1, 32, 32>}, {transform_indices = @transform_2, window_bounds = array<i64: 1, 1, 32>}, {transform_indices = @transform_3, window_bounds = array<i64: 1, 16, 32>}]} {
    %c0_i32 = arith.constant 0 : i32
    %0 = arith.cmpi eq, %arg3, %c0_i32 : i32
    %1 = arith.extui %0 : i1 to i32
    %c0_i32_0 = arith.constant 0 : i32
    %2 = arith.cmpi ne, %1, %c0_i32_0 : i32
    scf.if %2 {
      %cst_11 = arith.constant 0.000000e+00 : f32
      %14 = vector.broadcast %cst_11 : f32 to vector<16x32xf32>
      %c0_12 = arith.constant 0 : index
      %c0_13 = arith.constant 0 : index
      %15 = vector.load %arg8[%c0_12, %c0_13] : memref<16x32xf32, #tpu.memory_space<vmem>>, vector<16x32xf32>
      tpu.vector_store %arg8[%c0_12, %c0_13], %14 {strides = array<i32>} : memref<16x32xf32, #tpu.memory_space<vmem>>, vector<16x32xf32>,
    } else {
    }
    %c0 = arith.constant 0 : index
    %c0_1 = arith.constant 0 : index
    %3 = vector.load %arg8[%c0, %c0_1] : memref<16x32xf32, #tpu.memory_space<vmem>>, vector<16x32xf32>
    %c0_2 = arith.constant 0 : index
    %c0_3 = arith.constant 0 : index
    %4 = vector.load %arg4[%c0_2, %c0_3] : memref<16x32xf32, #tpu.memory_space<vmem>>, vector<16x32xf32>
    %5 = arith.truncf %4 : vector<16x32xf32> to vector<16x32xbf16>
    %c0_4 = arith.constant 0 : index
    %c0_5 = arith.constant 0 : index
    %c0_6 = arith.constant 0 : index
    %6 = vector.load %arg5[%c0_4, %c0_5, %c0_6] : memref<1x32x32xbf16, #tpu.memory_space<vmem>>, vector<1x32x32xbf16>
    %7 = vector.shape_cast %6 : vector<1x32x32xbf16> to vector<32x32xbf16>
    %cst = arith.constant dense<0.000000e+00> : vector<16x32xf32>
    %8 = tpu.matmul %5, %7, %cst {dimension_numbers = #tpu.dot_dimension_numbers<[1], [0], [0], [1], [0, 0, 1, 1], [], []>} : vector<16x32xbf16>, vector<32x32xbf16>, vector<16x32xf32> -> vector<16x32xf32>
    %9 = arith.addf %3, %8 : vector<16x32xf32>
    %c0_7 = arith.constant 0 : index
    %c0_8 = arith.constant 0 : index
    %10 = vector.load %arg8[%c0_7, %c0_8] : memref<16x32xf32, #tpu.memory_space<vmem>>, vector<16x32xf32>
    tpu.vector_store %arg8[%c0_7, %c0_8], %9 {strides = array<i32>} : memref<16x32xf32, #tpu.memory_space<vmem>>, vector<16x32xf32>,
    %c0_i32_9 = arith.constant 0 : i32
    %11 = arith.cmpi eq, %arg3, %c0_i32_9 : i32
    %12 = arith.extui %11 : i1 to i32
    %c0_i32_10 = arith.constant 0 : i32
    %13 = arith.cmpi ne, %12, %c0_i32_10 : i32
    scf.if %13 {
      %c0_11 = arith.constant 0 : index
      %c0_12 = arith.constant 0 : index
      %14 = vector.load %arg8[%c0_11, %c0_12] : memref<16x32xf32, #tpu.memory_space<vmem>>, vector<16x32xf32>
      %c0_13 = arith.constant 0 : index
      %c0_14 = arith.constant 0 : index
      %c0_15 = arith.constant 0 : index
      %15 = vector.load %arg6[%c0_13, %c0_14, %c0_15] : memref<1x1x32xf32, #tpu.memory_space<vmem>>, vector<1x1x32xf32>
      %16 = vector.shape_cast %15 : vector<1x1x32xf32> to vector<1x32xf32>
      %17 = vector.broadcast %16 : vector<1x32xf32> to vector<16x32xf32>
      %18 = arith.addf %14, %17 : vector<16x32xf32>
      %c0_16 = arith.constant 0 : index
      %c0_17 = arith.constant 0 : index
      %c0_18 = arith.constant 0 : index
      %19 = vector.load %arg7[%c0_16, %c0_17, %c0_18] : memref<1x16x32xf32, #tpu.memory_space<vmem>>, vector<1x16x32xf32>
      %20 = vector.shape_cast %19 : vector<1x16x32xf32> to vector<16x32xf32>
      %21 = vector.shape_cast %18 : vector<16x32xf32> to vector<1x16x32xf32>
      tpu.vector_store %arg7[%c0_16, %c0_17, %c0_18], %21 {strides = array<i32>} : memref<1x16x32xf32, #tpu.memory_space<vmem>>, vector<1x16x32xf32>,
    } else {
    }
    return
  }
  func.func @transform_0(%arg0: i32, %arg1: i32, %arg2: i32, %arg3: i32) -> (i32, i32) {
    %c0_i32 = arith.constant 0 : i32
    return %arg1, %arg3 : i32, i32
  }
  func.func @transform_1(%arg0: i32, %arg1: i32, %arg2: i32, %arg3: i32) -> (i32, i32, i32) {
    %c0_i32 = arith.constant 0 : i32
    return %arg0, %arg3, %arg2 : i32, i32, i32
  }
  func.func @transform_2(%arg0: i32, %arg1: i32, %arg2: i32, %arg3: i32) -> (i32, i32, i32) {
    %c0_i32 = arith.constant 0 : i32
    %c0_i32_0 = arith.constant 0 : i32
    return %arg0, %c0_i32, %arg2 : i32, i32, i32
  }
  func.func @transform_3(%arg0: i32, %arg1: i32, %arg2: i32, %arg3: i32) -> (i32, i32, i32) {
    %c0_i32 = arith.constant 0 : i32
    return %arg0, %arg1, %arg2 : i32, i32, i32
  }
}

</mosaic_0001>

<bundles_post_ra>
// kernel: tpu_custom_call.1
= control target key start
LH: loop header
LB: loop body
LE: loop exit
PB: predicated region body
PF: predicated region fallthrough
CT: control target
= control target key end

     0   :  { %8 = vsyncpa [#allocation4], 0  ;;  %s997_s0 = inlined_call_operand.hbm [shape: f32[16,32], index: 0, kind: input, shape index: {}]   ;;  %s998_s1 = inlined_call_operand.hbm [shape: bf16[3,32,32], index: 1, kind: input, shape index: {}]   ;;  %s999_s2 = inlined_call_operand.vmem [shape: f32[3,1,32], index: 2, kind: input, shape index: {}]   ;;  %s1000_s3 = inlined_call_operand.hbm [shape: f32[3,16,32], index: 3, kind: output, shape index: {}]  }
   0x1   :  { %9 = vsyncpa [#allocation7], 0 }
   0x2   :  { %11 = vsyncpa [#allocation7 + $0x1], 0 }
   0x3   :  { %12 = vsyncpa [#allocation5], 0 }
   0x4   :  { %14 = vsyncpa [#allocation5 + $0x1], 0  ;;  %s802_s12 = smov 0   ;;  %s804_s13 = smov 0  }
   0x5   :  { %s806_s14 = smov 0   ;;  %s808_s15 = smov 0  }
   0x6   :  { %s810_s16 = smov 0   ;;  %s812_s17 = smov 0  }
   0x7 LB: > { %s514_s18 = sadd.s32 4294967295, %s769_s17   ;;  %s515_s19 = sadd.s32 4294967294, %s769_s17   ;;  %s769_s17 = sphi %s812_s17, %s20_s17   ;;  %s765_s16 = sphi %s810_s16, %s1017_s16   ;;  %s761_s15 = sphi %s808_s15, %s1016_s15   ;;  %s757_s14 = sphi %s806_s14, %s1015_s14   ;;  %s753_s13 = sphi %s804_s13, %s1014_s13   ;;  %s749_s12 = sphi %s802_s12, %s1013_s12  }
   0x8   : > { %p98_p0 = scmp.ne.s32.totalorder %s753_s13, %s749_s12  ;;  %p836_p1 = scmp.eq.s32.totalorder %s514_s18, 0 }
   0x9   : > { %p840_p2 = scmp.eq.s32.totalorder %s514_s18, 2  ;;  %p160_p3 = scmp.eq.s32.totalorder %s515_s19, 2 }
   0xa   : > { %p846_p4 = por %p836_p1, %p98_p0  ;;  %p516_p5 = scmp.ge.s32.totalorder %s769_s17, 1 }
   0xb   : > { %p851_p6 = por %p160_p3, %p98_p0  ;;  %p167_p7 = scmp.lt.s32.totalorder %s769_s17, 4 }
   0xc   : > { %s771_s25 = smov [#allocation3]   ;;  %s46_s28 = sadd.s32 1, %s765_s16 }
   0xd   : > { %s1005_s23 = scalar_select %p851_p6, 1, 0 }
   0xe   : > { %p856_p8 = pnand %p516_p5, %p167_p7  ;;  %s183_s26 = sshll.u32 %s771_s25, 4  ;;  %s184_s26 = int_to_ptr.vmem [resolvable:$true] %s183_s26 }
   0xf   : > { %s642_s29 = scalar_lea.vmem %s184_s26, 256  ;;  %p650_p3 = scmp.lt.s32.totalorder %s184_s26, %s184_s26 }
  0x10   : > { %p556_p9 = pneg %p856_p8  ;;  %p643_p12 = scmp.ne.s32.totalorder %s184_s26, %s642_s29 }
  0x11   : > { %p651_p5 = scmp.lt.s32.totalorder %s642_s29, %s642_s29 }
  0x12   : > { %p864_p10 = pnand %p556_p9, %p836_p1 }
  0x13   : > { %p652_p7 = por %p651_p5, %p650_p3 }
  0x14   : > { %p633_p11 = pneg %p864_p10 }
  0x16   : > { %p645_p13 = pnand %p643_p12, %p633_p11 }
  0x18   : > { %p646_p0 = pneg %p645_p13 }
  0x1a   : > { %p653_p6 = pnand %p652_p7, %p646_p0 }
  0x1c   : > { %656 = shalt.err (!%p653_p6)
}
  0x1d   : > { %s772_s30 = smov 128   ;;  %s773_s4 = smov 8  }
  0x1e   : > { %559 = dma.hbm_to_vmem [thread:$0]  (!%p864_p10), %s997_s0, 256, %s184_s26, [#allocation4], %s772_s30, %s772_s30, %s773_s4  }
  0x1f   : > { %p48_p9 = scmp.ge.s32.totalorder %s46_s28, 3  ;;  %s85_s7 = sadd.s32 1, %s757_s14 }
  0x20   : > { %p92_p6 = scmp.ne.s32.totalorder %s757_s14, %s753_s13  ;;  %p93_p11 = scmp.eq.s32.totalorder %s769_s17, 0 }
  0x21   : > { %s1019_s28 = smov (%p48_p9, %s46_s28), 0  ;;  %p569_p0 = scmp.lt.s32.totalorder %s769_s17, 3 }
  0x22   : > { %p882_p12 = por %p93_p11, %p92_p6  ;;  %p888_p13 = por %p840_p2, %p92_p6 }
  0x23   : > { %s78_s10 = ssub.s32 %s765_s16, %s1019_s28  ;;  %s197_s11 = sand.u32 1, %s757_s14  }
  0x24   : > { %s1009_s9 = scalar_select %p888_p13, 1, 0 }
  0x25   : > { %p83_p10 = scmp.eq.s32.totalorder %s78_s10, 0  ;;  %s519_s18 = sshll.u32 %s197_s11, 4 }
  0x26   : > { %s535_s25 = sshll.u32 %s765_s16, 8  ;;  %s201_s30 = scalar_lea.vmem [#allocation6], %s519_s18 }
  0x27   : > { %s897_s19 = scalar_select %p83_p10, %s757_s14, %s85_s7  }
  0x28   : > { %s210_s29 = scalar_lea.hbm %s998_s1, %s535_s25  ;;  %s211_s4 = sshll.u32 %s201_s30, 4  ;;  %s212_s4 = int_to_ptr.vmem [resolvable:$true] %s211_s4 }
  0x29   : > { %p905_p2 = pnand %p569_p0, %p882_p12  ;;  %s198_s5 = scalar_lea.sflag [#allocation7], %s197_s11 }
  0x2a   : > { %s670_s6 = scalar_lea.vmem %s212_s4, 256  ;;  %s774_s7 = smov [#allocation6]  }
  0x2b   : > { %p659_p3 = pneg %p905_p2  ;;  %p671_p5 = scmp.ne.s32.totalorder %s212_s4, %s670_s6 }
  0x2c   : > { %s675_s10 = sshll.u32 %s774_s7, 4  ;;  %s676_s10 = int_to_ptr.vmem [resolvable:$false] %s675_s10 }
  0x2d   : > { %p673_p7 = pnand %p671_p5, %p659_p3  ;;  %s677_s25 = scalar_lea.vmem %s676_s10, 512 }
  0x2e   : > { %p678_p6 = scmp.lt.s32.totalorder %s212_s4, %s676_s10  ;;  %p679_p11 = scmp.lt.s32.totalorder %s677_s25, %s670_s6 }
  0x2f   : > { %p674_p9 = pneg %p673_p7 }
  0x30   : > { %p680_p10 = por %p679_p11, %p678_p6 }
  0x32   : > { %p681_p13 = pnand %p680_p10, %p674_p9 }
  0x34   : > { %684 = shalt.err (!%p681_p13)
}
  0x35   : > { %s775_s8 = smov 64   ;;  %s776_s18 = smov 4  }
  0x36   : > { %563 = dma.hbm_to_vmem [thread:$0]  (!%p905_p2), %s210_s29, 256, %s212_s4, %s198_s5, %s775_s8, %s775_s8, %s776_s18  }
  0x37   : > { %232 = sbr.rel (%p856_p8) target bundleno = 297 (0x129), region = 32 }
  0x3c   : > { %736 = dma.done.wait (%p836_p1), [#allocation4], 256  }
  0x3d   : > { %738 = vsyncadd (%p836_p1), [#allocation4], 4294967040  ;;  %s920_s11 = sand.u32 1, %s753_s13  }
  0x3e   : > { %s524_s26 = sshll.u32 %s920_s11, 4  ;;  %s239_s27 = scalar_lea.sflag [#allocation7], %s920_s11 }
  0x3f   : > { %s242_s29 = scalar_lea.vmem [#allocation6], %s524_s26 }
  0x40   : > { %740 = dma.done.wait (%p846_p4), %s239_s27, 256  }
  0x41   : > { %742 = vsyncadd (%p846_p4), %s239_s27, 4294967040  ;;  %vm285_vm0 = vcmask 261120   ;;  %v777_v0 = vmov 0.0   ;;  %vm778_vm1 = vmmov 0   ;;  %v629_v1 = vld [vmem:[%s242_s29 + $0x8] sm:$0xff]   ;;  %v630_v2 = vld [vmem:[%s242_s29] sm:$0xff]  }
  0x42   : > { %540 = vmatprep.subr.bf16.mxu0 %v777_v0  ;;  %544 = vmatprep.mubr.msk.bf16.mxu0 %vm778_vm1, %v777_v0  ;;  %286 = vst.msk [vmem:[#allocation2] sm:$0xff] %vm285_vm0, %v777_v0  ;;  %287 = vst.msk [vmem:[#allocation2 + $0x8] sm:$0xff] %vm285_vm0, %v777_v0  ;;  %v290_v3 = vld [vmem:[#allocation3] sm:$0xff]  ;;  %v291_v4 = vld [vmem:[#allocation3 + $0x8] sm:$0xff]  ;;  %p273_p1 = scmp.lt.s32.totalorder %s761_s15, 2  ;;  %s536_s4 = sshll.u32 %s761_s15, 8 }
  0x43   : > { %541 = vmatpush3.bf16.msra.mxu0 %v629_v1  ;;  %v292_v5 = vpack.c.bf16 %v291_v4, %v290_v3  ;;  %s270_s21 = scalar_lea.vmem [#allocation8], %s524_s26  ;;  %s947_s10 = scalar_lea.hbm %s1000_s3, %s536_s4 }
  0x44   : > { %542 = vmatprep.subr.bf16.mxu0 %v777_v0  ;;  %s274_s20 = scalar_select %p273_p1, %s761_s15, 2 }
  0x45   : > { %s391_s5 = sshll.u32 %s270_s21, 4  ;;  %s375_s15 = scalar_lea.sflag [#allocation5], %s920_s11  ;;  %s949_s5 = int_to_ptr.vmem [resolvable:$true] %s391_s5 }
  0x46   : > { %s278_s30 = scalar_lea.vmem %s999_s2, %s274_s20  ;;  %s685_s25 = scalar_lea.vmem %s949_s5, 256 }
  0x47   : > { %543 = vmatpush3.bf16.msra.mxu0 %v630_v2  ;;  %v529_v14 = vld [vmem:[%s278_s30] ss:$0 sm:$0xff]  ;;  %p686_p4 = scmp.ne.s32.totalorder %s949_s5, %s685_s25  ;;  %p1011_p8 = scmp.ne.s32.totalorder %s1009_s9, 0 }
  0x48   : > { %s779_s8 = smov [#allocation8]  }
  0x49   : > { %v288_v6 = vld [vmem:[#allocation2] sm:$0xff]  ;;  %v289_v10 = vld [vmem:[#allocation2 + $0x8] sm:$0xff]  ;;  %p687_p12 = pnand %p686_p4, %p1011_p8  ;;  %s689_s18 = sshll.u32 %s779_s8, 4  ;;  %s690_s18 = int_to_ptr.vmem [resolvable:$false] %s689_s18 }
  0x4a   : > { %545 = vmatmul.mubr.msk.bf16.vlgmr.msra.gmra.mxu0 %vm285_vm0, %v292_v5  ;;  %s691_s26 = scalar_lea.vmem %s690_s18, 512  ;;  %p692_p0 = scmp.lt.s32.totalorder %s949_s5, %s690_s18 }
  0x4b   : > { %p688_p13 = pneg %p687_p12  ;;  %p693_p2 = scmp.lt.s32.totalorder %s691_s26, %s685_s25 }
  0x4d   : > { %p694_p3 = por %p693_p2, %p692_p0 }
  0x4f   : > { %p695_p5 = pnand %p694_p3, %p688_p13 }
 0x10a   : > { %v347_v7 = vpop.f32.mrf.mxu0 }
 0x10b   : > { %v354_v8 = vadd.f32 %v347_v7, %v288_v6 }
 0x10c   : > { %v546_v9 = vpop.f32.mrf.mxu0 }
 0x10d   : > { %356 = vst.msk [vmem:[#allocation2] sm:$0xff] %vm285_vm0, %v354_v8 }
 0x10e   : > { %v350_v11 = vpop.f32.mrf.mxu0 }
 0x10f   : > { %v355_v12 = vadd.f32 %v350_v11, %v289_v10 }
 0x110   : > { %v547_v13 = vpop.f32.mrf.mxu0 }
 0x111   : > { %357 = vst.msk [vmem:[#allocation2 + $0x8] sm:$0xff] %vm285_vm0, %v355_v12 }
 0x114   : > { %v361_v15 = vld [vmem:[#allocation2] sm:$0xff] }
 0x115   : > { %v370_v16 = vadd.f32 %v529_v14, %v361_v15 }
 0x117   : > { %372 = vst.msk [vmem:[%s270_s21] sm:$0xff] %vm285_vm0, %v370_v16 }
 0x118   : > { %v362_v17 = vld [vmem:[#allocation2 + $0x8] sm:$0xff] }
 0x119   : > { %v371_v18 = vadd.f32 %v529_v14, %v362_v17 }
 0x11b   : > { %373 = vst.msk [vmem:[%s270_s21 + $0x8] sm:$0xff] %vm285_vm0, %v371_v18 }
 0x11c   : > { %698 = shalt.err (!%p695_p5)
}
 0x11d   : > { %s699_s27 = scalar_lea.hbm %s947_s10, 256  ;;  %s703_s22 = scalar_lea.hbm %s1000_s3, 768 }
 0x11e   : > { %p700_p7 = scmp.ne.s32.totalorder %s947_s10, %s699_s27  ;;  %p704_p11 = scmp.lt.s32.totalorder %s947_s10, %s1000_s3 }
 0x11f   : > { %p705_p10 = scmp.lt.s32.totalorder %s703_s22, %s699_s27 }
 0x120   : > { %p701_p9 = pnand %p700_p7, %p1011_p8 }
 0x121   : > { %p706_p1 = por %p705_p10, %p704_p11 }
 0x122   : > { %p702_p6 = pneg %p701_p9 }
 0x124   : > { %p707_p4 = pnand %p706_p1, %p702_p6 }
 0x126   : > { %710 = shalt.err (!%p707_p4)
}
 0x127   : > { %s780_s4 = smov 128   ;;  %s781_s21 = smov 8  }
 0x128   : > { %554 = dma.vmem_to_hbm [thread:$0]  (%p1011_p8), %s949_s5, 256, %s947_s10, %s375_s15, %s780_s4, %s780_s4, %s781_s21  }
 0x129 PF: > { %p571_p12 = scmp.ge.s32.totalorder %s769_s17, 2  ;;  %s406_s6 = sand.u32 1, %s749_s12  }
 0x12a   : > { %p1012_p13 = scmp.ne.s32.totalorder %s1005_s23, 0  ;;  %s407_s7 = scalar_lea.sflag [#allocation5], %s406_s6 }
 0x12c   : > { %p565_p0 = pnand %p571_p12, %p1012_p13 }
 0x12e   : > { %p566_p2 = pneg %p565_p0 }
 0x130   : > { %744 = dma.done.wait (%p566_p2), %s407_s7, 256  }
 0x131   : > { %746 = vsyncadd (%p566_p2), %s407_s7, 4294967040  ;;  %s20_s17 = sadd.s32 1, %s769_s17   ;;  %s1013_s12 = smov %s753_s13 }
 0x132   : > { %p17_p3 = scmp.ge.s32.totalorder %s20_s17, 5   ;;  %s1014_s13 = smov %s757_s14 }
 0x133   : > { %s1015_s14 = smov %s897_s19  ;;  %s1016_s15 = smov %s765_s16 }
 0x134   : > { %s1017_s16 = smov %s1019_s28  ;;  %19 = sbr.rel (!%p17_p3) target bundleno = 7 (0x7), region = 94 }
 0x139   :  { %412 = vsyncpa [#allocation4], 1 }
 0x13a   :  { %414 = vsyncpa [#allocation4 + $0x1], 1 }
 0x13b   :  { %415 = vsyncpa [#allocation7], 1 }
 0x13c   :  { %417 = vsyncpa [#allocation7 + $0x1], 1 }
 0x13d   :  { %418 = vsyncpa [#allocation5], 1 }
 0x13e   :  { %420 = vsyncpa [#allocation5 + $0x1], 1 }

</bundles_post_ra>
